<compile_context>
chip_gen: v7x
topology: tpu7x:2x2x1
jax: 0.10.0
libtpu: 0.0.40
codegen_flags: <defaults>
</compile_context>

<pallas_src>
import jax
import jax.numpy as jnp
import numpy as np
from jax.experimental import pallas as pl
from jax.experimental.pallas import tpu as pltpu

_LANE = 128
_SUBLANE = {1: 32, 2: 16, 4: 8}  # dtype-itemsize -> row granularity


def _add_noise_kernel(x_ref, std_ref, o_ref):
    # x_ref: (block_rows, tile_hw); std_ref: (block_rows, 1) already in out dtype.
    # Per-row scalar broadcast along the lane axis + elementwise add (VPU only).
    o_ref[...] = x_ref[...].astype(o_ref.dtype) + std_ref[...]


def add_gaussian_noise(img: jax.Array, std: jax.Array, *, donate: bool = False) -> jax.Array:
    """Equivalent of `img + std` with std of shape (N, C, 1, 1), img NCHW."""
    N, C, H, W = img.shape
    assert std.shape == (N, C, 1, 1), std.shape
    R, HW = N * C, H * W

    out_dtype = jnp.result_type(img.dtype, std.dtype)  # PyTorch-style promotion
    in_bpe = jnp.dtype(img.dtype).itemsize
    out_bpe = jnp.dtype(out_dtype).itemsize
    bpe = max(in_bpe, out_bpe)
    sublane = _SUBLANE.get(in_bpe, 8)

    # Lane-dense 2-D view: one (n, c) plane per row.  Contiguous reshapes are
    # free layout plumbing outside the kernel.
    x2 = img.reshape(R, HW)
    s2 = std.reshape(R, 1).astype(out_dtype)

    # --- Block sizing -------------------------------------------------------
    # ~4 MiB blocks: pipelined footprint 2*(in + out) stays <= ~16-32 MiB, well
    # under v7x's 64 MiB physical VMEM and liftable above the 16/32 MiB scoped
    # defaults via vmem_limit_bytes, while per-step overhead is a few percent.
    target_block_bytes = 4 << 20
    row_bytes = HW * bpe
    min_rows = R if R < sublane else sublane

    if min_rows * row_bytes > target_block_bytes and HW > _LANE:
        # Even a minimal-row block with full HW busts the budget: tile the lane
        # (HW) axis in multiples of 128.
        block_rows = min_rows
        hw_groups = pl.cdiv(HW, _LANE)
        groups_fit = max(1, target_block_bytes // (block_rows * _LANE * bpe))
        tile_groups = min(hw_groups, groups_fit)
        tile_hw = HW if tile_groups >= hw_groups else tile_groups * _LANE
    else:
        tile_hw = HW
        if R <= sublane:
            block_rows = R  # block dim == full array dim (allowed even if not %8)
        else:
            rows_fit = max(sublane,
                           (target_block_bytes // max(row_bytes, 1)) // sublane * sublane)
            block_rows = min(rows_fit, max(sublane, (R // sublane) * sublane))

    # Guarantee >= 2 grid steps per TensorCore (4 total) for non-tiny inputs so
    # auto double-buffering actually overlaps prefetch of step i+1 with compute
    # and writeback of step i, and both v7x TCs get work.  Shrink rows first
    # (keeps lane-dense stores), then columns.
    if R * HW * bpe >= (1 << 20):
        while pl.cdiv(R, block_rows) * pl.cdiv(HW, tile_hw) < 4:
            if block_rows > sublane:
                block_rows = max(sublane, (block_rows // 2) // sublane * sublane)
            elif tile_hw > _LANE:
                new_tile = max(1, pl.cdiv(tile_hw, _LANE) // 2) * _LANE
                if new_tile >= tile_hw:
                    break
                tile_hw = new_tile
            else:
                break

    grid = (pl.cdiv(R, block_rows), pl.cdiv(HW, tile_hw))

    # Optional in-place update: halves peak HBM footprint when the caller can
    # donate img (only legal when no dtype promotion happens).
    io_aliases = {0: 0} if (donate and out_dtype == img.dtype) else {}

    out2 = pl.pallas_call(
        _add_noise_kernel,
        out_shape=jax.ShapeDtypeStruct((R, HW), out_dtype),
        grid_spec=pltpu.PrefetchScalarGridSpec(
            num_scalar_prefetch=0,
            grid=grid,
            in_specs=[
                pl.BlockSpec((block_rows, tile_hw), lambda i, j: (i, j)),
                pl.BlockSpec((block_rows, 1), lambda i, j: (i, 0)),
            ],
            out_specs=pl.BlockSpec((block_rows, tile_hw), lambda i, j: (i, j)),
        ),
        compiler_params=pltpu.CompilerParams(
            dimension_semantics=("parallel", "parallel"),
            # Above the 16/32 MiB scoped defaults (v5e/v6e), still leaves
            # headroom under v7x's 64 MiB physical VMEM.
            vmem_limit_bytes=48 << 20,
        ),
        cost_estimate=pl.CostEstimate(
            flops=R * HW,
            transcendentals=0,
            bytes_accessed=R * HW * (in_bpe + out_bpe) + R * out_bpe,
        ),
        input_output_aliases=io_aliases,
    )(x2, s2)
    return out2.reshape(N, C, H, W)


class GaussianNoise:
    """JAX/Pallas port of the PyTorch `GaussianNoise` module."""

    def __init__(self, batch_size: int, shuffle_every: bool = False,
                 std: float = 1.0, max_iter: int = 400, seed: int = 0):
        self.batch_size, self.std_p, self.max_iter = batch_size, std, max_iter
        # TODO(synk): PyTorch draws from torch.randn(...).cuda(); we use
        # jax.random.normal — same distribution/semantics, different bit values.
        self._key = jax.random.PRNGKey(seed)
        self.std = None
        self.rem = max_iter - 1
        self.shuffle()
        self.shuffle_every = shuffle_every

    def shuffle(self):
        self._key, sub = jax.random.split(self._key)
        self.std = (
            jax.random.normal(sub, (self.batch_size, 3, 1, 1), dtype=jnp.float32)
            * self.rem * self.std_p / self.max_iter
        )
        self.rem = (self.rem - 1 + self.max_iter) % self.max_iter

    def __call__(self, img: jax.Array) -> jax.Array:
        if self.shuffle_every:
            self.shuffle()
        return add_gaussian_noise(img, self.std)


if __name__ == "__main__":
    key = jax.random.PRNGKey(0)
    N, C, H, W = 2, 3, 16, 16  # module fixes 3 channels via std shape (B, 3, 1, 1)
    img = jax.random.normal(key, (N, C, H, W), dtype=jnp.float32)

    module = GaussianNoise(batch_size=N, shuffle_every=False, std=1.0,
                           max_iter=400, seed=0)
    out = jax.block_until_ready(module(img))
    ref = img + module.std  # pure-JAX reference (same broadcast add)
    np.testing.assert_allclose(np.asarray(out), np.asarray(ref), rtol=0, atol=0)

    # Extra check: H*W not a multiple of 128 (masked trailing lanes path).
    img2 = jax.random.normal(jax.random.PRNGKey(1), (N, C, 20, 20), dtype=jnp.float32)
    out2 = jax.block_until_ready(add_gaussian_noise(img2, module.std))
    np.testing.assert_allclose(np.asarray(out2), np.asarray(img2 + module.std),
                               rtol=0, atol=0)

    # Extra check: mixed precision (bf16 img + f32 std -> f32, PyTorch promotion).
    img3 = jax.random.normal(jax.random.PRNGKey(2), (N, C, H, W), dtype=jnp.bfloat16)
    out3 = jax.block_until_ready(add_gaussian_noise(img3, module.std))
    np.testing.assert_allclose(np.asarray(out3), np.asarray(img3 + module.std),
                               rtol=0, atol=0)

    print("KERNEL_OK")
</pallas_src>

<mosaic_0001>
module attributes {stable_mosaic.version = 11 : i64} {
  func.func @_add_noise_kernel(%arg0: i32, %arg1: i32, %arg2: memref<6x256xf32, #tpu.memory_space<vmem>>, %arg3: memref<6x1xf32, #tpu.memory_space<vmem>>, %arg4: memref<6x256xf32, #tpu.memory_space<vmem>>) attributes {dimension_semantics = [#tpu.dimension_semantics<parallel>, #tpu.dimension_semantics<parallel>], iteration_bounds = array<i64: 1, 1>, scalar_prefetch = 0 : i64, scratch_operands = 0 : i64, tpu.core_type = #tpu.core_type<tc>, window_params = [{transform_indices = @transform_0, window_bounds = array<i64: 6, 256>}, {transform_indices = @transform_1, window_bounds = array<i64: 6, 1>}, {transform_indices = @transform_2, window_bounds = array<i64: 6, 256>}]} {
    %c0 = arith.constant 0 : index
    %c0_0 = arith.constant 0 : index
    %0 = vector.load %arg2[%c0, %c0_0] : memref<6x256xf32, #tpu.memory_space<vmem>>, vector<6x256xf32>
    %c0_1 = arith.constant 0 : index
    %c0_2 = arith.constant 0 : index
    %1 = vector.load %arg3[%c0_1, %c0_2] : memref<6x1xf32, #tpu.memory_space<vmem>>, vector<6x1xf32>
    %2 = vector.broadcast %1 : vector<6x1xf32> to vector<6x256xf32>
    %3 = arith.addf %0, %2 : vector<6x256xf32>
    %c0_3 = arith.constant 0 : index
    %c0_4 = arith.constant 0 : index
    %4 = vector.load %arg4[%c0_3, %c0_4] : memref<6x256xf32, #tpu.memory_space<vmem>>, vector<6x256xf32>
    tpu.vector_store %arg4[%c0_3, %c0_4], %3 {strides = array<i32>} : memref<6x256xf32, #tpu.memory_space<vmem>>, vector<6x256xf32>,
    return
  }
  func.func @transform_0(%arg0: i32, %arg1: i32) -> (i32, i32) {
    %c0_i32 = arith.constant 0 : i32
    return %arg0, %arg1 : i32, i32
  }
  func.func @transform_1(%arg0: i32, %arg1: i32) -> (i32, i32) {
    %c0_i32 = arith.constant 0 : i32
    %c0_i32_0 = arith.constant 0 : i32
    return %arg0, %c0_i32 : i32, i32
  }
  func.func @transform_2(%arg0: i32, %arg1: i32) -> (i32, i32) {
    %c0_i32 = arith.constant 0 : i32
    return %arg0, %arg1 : i32, i32
  }
}

</mosaic_0001>

<bundles_post_ra>
// kernel: tpu_custom_call.1
= control target key start
LH: loop header
LB: loop body
LE: loop exit
PB: predicated region body
PF: predicated region fallthrough
CT: control target
= control target key end

     0   :  { %7 = vsyncpa [#allocation3], 0  ;;  %s148_s0 = inlined_call_operand.hbm [shape: f32[6,256], index: 0, kind: input, shape index: {}]   ;;  %s149_s1 = inlined_call_operand.vmem [shape: f32[6,1], index: 1, kind: input, shape index: {}]   ;;  %s150_s2 = inlined_call_operand.hbm [shape: f32[6,256], index: 2, kind: output, shape index: {}]  }
   0x1   :  { %8 = vsyncpa [#allocation4], 0  ;;  %s103_s9 = smov [#allocation2]   ;;  %s55_s13 = scalar_lea.hbm %s148_s0, 256 }
   0x2   :  { %s15_s10 = sshll.u32 %s103_s9, 4  ;;  %p56_p0 = scmp.ne.s32.totalorder %s148_s0, %s55_s13  ;;  %s16_s10 = int_to_ptr.vmem [resolvable:$true] %s15_s10 }
   0x3   :  { %p59_p1 = scmp.lt.u32.totalorder %s55_s13, %s148_s0 }
   0x5   :  { %p61_p2 = pnand %p59_p1, %p56_p0 }
   0x7   :  { %64 = shalt.err (!%p61_p2)
}
   0x8   :  { %s65_s18 = scalar_lea.vmem %s16_s10, 256  ;;  %p70_p4 = scmp.lt.s32.totalorder %s16_s10, %s16_s10 }
   0x9   :  { %p66_p3 = scmp.ne.s32.totalorder %s16_s10, %s65_s18  ;;  %p71_p5 = scmp.lt.s32.totalorder %s65_s18, %s65_s18 }
   0xb   :  { %p72_p6 = por %p71_p5, %p70_p4 }
   0xd   :  { %p73_p7 = pnand %p72_p6, %p66_p3 }
   0xf   :  { %76 = shalt.err (!%p73_p7)
}
  0x10   :  { %18 = dma.hbm_to_vmem [thread:$0]  %s148_s0, 256, %s16_s10, [#allocation3]  }
  0x11   :  { %99 = dma.done.wait [#allocation3], 256  }
  0x12   :  { %100 = vsyncadd [#allocation3], 4294967040  ;;  %v104_v0 = vmov 0   ;;  %v26_v1 = vld [vmem:[%s149_s1] sm:$0x3f]  ;;  %s105_s23 = smov [#allocation5]  }
  0x13   :  { %54 = vset.pattern.permute.xlu0 %v104_v0  ;;  %v24_v2 = vld [vmem:[#allocation2] sm:$0x3f]  ;;  %v25_v3 = vld [vmem:[#allocation2 + $0x8] sm:$0x3f]  ;;  %s42_s24 = sshll.u32 %s105_s23, 4  ;;  %s43_s24 = int_to_ptr.vmem [resolvable:$true] %s42_s24 }
  0x14   :  { %29 = vperm.xlu0 %54, %v26_v1   ;;  %s77_s0 = scalar_lea.vmem %s43_s24, 256  ;;  %p82_p9 = scmp.lt.s32.totalorder %s43_s24, %s43_s24 }
  0x15   :  { %p78_p8 = scmp.ne.s32.totalorder %s43_s24, %s77_s0  ;;  %p83_p10 = scmp.lt.s32.totalorder %s77_s0, %s77_s0 }
  0x17   :  { %p84_p11 = por %p83_p10, %p82_p9 }
  0x19   :  { %p85_p12 = pnand %p84_p11, %p78_p8 }
  0x93   :  { %v30_v4 = vpop.permute.xlu0 %29 }
  0x94   :  { %v32_v5 = vadd.f32 %v30_v4, %v24_v2  ;;  %v33_v6 = vadd.f32 %v30_v4, %v25_v3 }
  0x96   :  { %34 = vst [vmem:[#allocation5] sm:$0x3f] %v32_v5  ;;  %35 = vst [vmem:[#allocation5 + $0x8] sm:$0x3f] %v33_v6 }
  0x97   :  { %88 = shalt.err (!%p85_p12)
}
  0x98   :  { %s89_s26 = scalar_lea.hbm %s150_s2, 256 }
  0x99   :  { %p90_p13 = scmp.ne.s32.totalorder %s150_s2, %s89_s26  ;;  %p93_p0 = scmp.lt.u32.totalorder %s89_s26, %s150_s2 }
  0x9b   :  { %p95_p1 = pnand %p93_p0, %p90_p13 }
  0x9d   :  { %98 = shalt.err (!%p95_p1)
}
  0x9e   :  { %45 = dma.vmem_to_hbm [thread:$0]  %s43_s24, 256, %s150_s2, [#allocation4]  }
  0x9f   :  { %101 = dma.done.wait [#allocation4], 256  }
  0xa0   :  { %102 = vsyncadd [#allocation4], 4294967040 }
  0xa1   :  { %49 = vsyncpa [#allocation3], 1 }
  0xa2   :  { %50 = vsyncpa [#allocation4], 1 }

</bundles_post_ra>
